<compile_context>
chip_gen: v7x
topology: tpu7x:2x2x1
jax: 0.10.0
libtpu: 0.0.40
codegen_flags: <defaults>
</compile_context>

<pallas_src>
import functools
from typing import NamedTuple

import jax
import jax.numpy as jnp
from jax.experimental import pallas as pl
from jax.experimental.pallas import tpu as pltpu


def _round_up(x, m):
    return (x + m - 1) // m * m


def _cdiv(a, b):
    return (a + b - 1) // b


def _default_vmem_budget():
    """Per-generation scoped-VMEM budget (bytes) used to size tiles."""
    kind = ""
    try:
        kind = jax.devices()[0].device_kind.lower()
    except Exception:
        pass
    if "v5" in kind or "v6" in kind:
        return 100 * 1024 * 1024        # 128 MiB physical VMEM -> generous scoped limit
    return 48 * 1024 * 1024             # v7x (and unknown): 64 MiB physical -> headroom


class _PolicyMeta(NamedTuple):
    F: int
    H: int
    A: int
    A_pad: int
    F_pad: int
    f_block: int
    num_k: int
    use_bf16: bool
    vmem_budget: int


# ----------------------------------------------------------------------------
# Kernels
# ----------------------------------------------------------------------------
def _policy_mlp_kernel(x_ref, w1_ref, b1_ref, w2_ref, b2_ref, o_ref, *, mm_dtype):
    # x: (TB, F)  w1: (F, H)  b1: (1, H)  w2: (H, Ap)  b2: (1, Ap)  out: (TB, Ap)
    x = x_ref[...].astype(mm_dtype)                  # in-kernel cast, hides under DMA
    h = jnp.dot(x, w1_ref[...], preferred_element_type=jnp.float32) + b1_ref[...]
    h = jnp.maximum(h, 0.0)                          # ReLU in f32 (v5e: no bf16 VALU)
    h = h.astype(w2_ref.dtype)
    out = jnp.dot(h, w2_ref[...], preferred_element_type=jnp.float32) + b2_ref[...]
    o_ref[...] = out.astype(o_ref.dtype)


def _policy_mlp_ktiled_kernel(x_ref, w1_ref, b1_ref, w2_ref, b2_ref, o_ref, acc_ref,
                              *, mm_dtype, valid_f, f_block):
    # Grid = (batch tiles, F tiles).  acc_ref: (TB, H) f32 accumulator scratch.
    k = pl.program_id(1)

    @pl.when(k == 0)
    def _():
        acc_ref[...] = jnp.zeros_like(acc_ref)

    x = x_ref[...]
    if valid_f % f_block != 0:
        # Ragged last F tile: x columns past valid_f are out-of-bounds garbage.
        # W1 is zero-padded there, but 0 * garbage could be NaN -> zero x too.
        col = jax.lax.broadcasted_iota(jnp.int32, x.shape, 1) + k * f_block
        x = jnp.where(col < valid_f, x, 0.0)
    acc_ref[...] += jnp.dot(x.astype(mm_dtype), w1_ref[...],
                            preferred_element_type=jnp.float32)

    @pl.when(k == pl.num_programs(1) - 1)
    def _():
        h = jnp.maximum(acc_ref[...] + b1_ref[...], 0.0).astype(w2_ref.dtype)
        out = jnp.dot(h, w2_ref[...], preferred_element_type=jnp.float32) + b2_ref[...]
        o_ref[...] = out.astype(o_ref.dtype)


# ----------------------------------------------------------------------------
# One-time parameter preparation (hoisted out of the per-call path)
# ----------------------------------------------------------------------------
def prepare_policy_params(w1, b1, w2, b2, *, use_bf16=False, f_block=None,
                          vmem_budget_bytes=None):
    """Lane-pads W2/b2 to a 128-multiple action dim, optionally casts matmul
    operands to bf16, and (for large F) zero-pads W1 so it can be streamed with
    an F-axis accumulator.  Returns ((w1, b1, w2, b2), meta)."""
    F, H = w1.shape
    A = w2.shape[1]
    A_pad = _round_up(max(A, 128), 128)
    budget = int(vmem_budget_bytes) if vmem_budget_bytes is not None else _default_vmem_budget()
    mm_dtype = jnp.bfloat16 if use_bf16 else jnp.float32
    mm_isz = jnp.dtype(mm_dtype).itemsize

    small_w = H * 4 + H * A_pad * mm_isz + A_pad * 4          # b1 + W2 + b2 (single-buffered)

    def fits(fb, tb):
        w1_bytes = fb * H * mm_isz                             # W1 tile, single-buffered
        per_row = 2 * fb * 4 + 2 * A_pad * 4 + H * 4           # x dbuf (f32) + out dbuf + hidden
        return small_w + w1_bytes + tb * per_row <= budget

    if f_block is None:
        if fits(F, 256):
            f_block = F                                        # whole W1 VMEM-resident
        else:
            fb = 512
            while fb * 2 < F and fits(fb * 2, 256):
                fb *= 2
            f_block = fb
    if f_block >= F:
        f_block = F                                            # single F block
    else:
        f_block = max(128, (f_block // 128) * 128)             # lane constraint on x tile

    num_k = _cdiv(F, f_block)
    F_pad = num_k * f_block

    w1f = w1
    if num_k > 1 and F_pad > F:
        w1f = jnp.zeros((F_pad, H), w1.dtype).at[:F, :].set(w1)
    w1_p = w1f.astype(mm_dtype)
    w2_p = jnp.zeros((H, A_pad), mm_dtype).at[:, :A].set(w2.astype(mm_dtype))
    b1_p = jnp.asarray(b1, jnp.float32).reshape(1, H)
    b2_p = jnp.zeros((1, A_pad), jnp.float32).at[:, :A].set(
        jnp.asarray(b2, jnp.float32).reshape(1, A))

    meta = _PolicyMeta(F=F, H=H, A=A, A_pad=A_pad, F_pad=F_pad, f_block=f_block,
                       num_k=num_k, use_bf16=use_bf16, vmem_budget=budget)
    return (w1_p, b1_p, w2_p, b2_p), meta


# ----------------------------------------------------------------------------
# Forward
# ----------------------------------------------------------------------------
@functools.partial(jax.jit, static_argnames=("meta", "block_b"))
def _policy_forward_impl(z, w1_p, b1_p, w2_p, b2_p, *, meta, block_b=None):
    B = z.shape[0]
    x = z.reshape(B, -1)                       # nn.Flatten(start_dim=1), row-major
    assert x.shape[1] == meta.F, (x.shape, meta.F)

    F, H, A_pad = meta.F, meta.H, meta.A_pad
    fb, num_k = meta.f_block, meta.num_k
    mm_dtype = jnp.bfloat16 if meta.use_bf16 else jnp.float32
    mm_isz = jnp.dtype(mm_dtype).itemsize

    # --- batch tile derived from the VMEM budget (weights single-buffered) ---
    weight_bytes = fb * H * mm_isz + H * 4 + H * A_pad * mm_isz + A_pad * 4
    per_row = 2 * fb * x.dtype.itemsize + 2 * A_pad * 4 + H * 4
    tb = (meta.vmem_budget - weight_bytes) // per_row
    tb = min(tb, block_b if block_b is not None else 1024)
    tb = min(tb, max(8, _round_up(_cdiv(B, 2), 8)))     # >=2 grid steps (v7x megacore)
    tb = max(8, (tb // 8) * 8)
    num_b = _cdiv(B, tb)

    cost = pl.CostEstimate(
        flops=2 * B * (F * H + H * A_pad),
        transcendentals=0,
        bytes_accessed=(x.size * x.dtype.itemsize
                        + w1_p.size * mm_isz + w2_p.size * mm_isz
                        + (b1_p.size + b2_p.size) * 4
                        + B * A_pad * 4),
    )
    compiler_params = pltpu.CompilerParams(
        dimension_semantics=("parallel",) if num_k == 1 else ("parallel", "arbitrary"),
        vmem_limit_bytes=meta.vmem_budget,
    )
    # Constant-index weight/bias operands: single-buffered (halve weight VMEM).
    resident = functools.partial(pl.BlockSpec, pipeline_mode=pl.Buffered(1))

    if num_k == 1:
        out = pl.pallas_call(
            functools.partial(_policy_mlp_kernel, mm_dtype=mm_dtype),
            out_shape=jax.ShapeDtypeStruct((B, A_pad), jnp.float32),
            grid=(num_b,),
            in_specs=[
                pl.BlockSpec((tb, F), lambda i: (i, 0)),       # x: streamed over batch
                resident((F, H), lambda i: (0, 0)),            # W1: VMEM-resident
                resident((1, H), lambda i: (0, 0)),            # b1
                resident((H, A_pad), lambda i: (0, 0)),        # W2 (lane-padded)
                resident((1, A_pad), lambda i: (0, 0)),        # b2 (lane-padded)
            ],
            out_specs=pl.BlockSpec((tb, A_pad), lambda i: (i, 0)),
            compiler_params=compiler_params,
            cost_estimate=cost,
        )(x, w1_p, b1_p, w2_p, b2_p)
    else:
        out = pl.pallas_call(
            functools.partial(_policy_mlp_ktiled_kernel, mm_dtype=mm_dtype,
                              valid_f=F, f_block=fb),
            out_shape=jax.ShapeDtypeStruct((B, A_pad), jnp.float32),
            grid=(num_b, num_k),                               # reduction axis last
            in_specs=[
                pl.BlockSpec((tb, fb), lambda i, k: (i, k)),   # x: batch x F tiles
                pl.BlockSpec((fb, H), lambda i, k: (k, 0)),    # W1: streamed over F
                resident((1, H), lambda i, k: (0, 0)),
                resident((H, A_pad), lambda i, k: (0, 0)),
                resident((1, A_pad), lambda i, k: (0, 0)),
            ],
            out_specs=pl.BlockSpec((tb, A_pad), lambda i, k: (i, 0)),
            scratch_shapes=[pltpu.VMEM((tb, H), jnp.float32)],
            compiler_params=compiler_params,
            cost_estimate=cost,
        )(x, w1_p, b1_p, w2_p, b2_p)

    # TODO(synk): optionally emit a bf16 output to halve the padded-output write.
    return out[:, :meta.A]                                     # strip lane padding


def policy_net_forward(z, params, *, block_b=None):
    """z: (B, num_patches, embed_dim) -> (B, action_dim) float32 logits."""
    (w1_p, b1_p, w2_p, b2_p), meta = params
    return _policy_forward_impl(z, w1_p, b1_p, w2_p, b2_p, meta=meta, block_b=block_b)


def init_policy_net_params(key, embed_dim, num_patches, action_dim, hidden_dim=128):
    """Matches nn.Linear default init: U(-1/sqrt(fan_in), +1/sqrt(fan_in))."""
    in_features = embed_dim * num_patches
    k1, k2, k3, k4 = jax.random.split(key, 4)
    bound1 = 1.0 / jnp.sqrt(in_features)
    bound2 = 1.0 / jnp.sqrt(hidden_dim)
    w1 = jax.random.uniform(k1, (in_features, hidden_dim), jnp.float32, -bound1, bound1)
    b1 = jax.random.uniform(k2, (1, hidden_dim), jnp.float32, -bound1, bound1)
    w2 = jax.random.uniform(k3, (hidden_dim, action_dim), jnp.float32, -bound2, bound2)
    b2 = jax.random.uniform(k4, (1, action_dim), jnp.float32, -bound2, bound2)
    return w1, b1, w2, b2


def _ref_forward(z, w1, b1, w2, b2):
    # Pure-JAX reference (Flatten -> Linear -> ReLU -> Linear), full-precision dots.
    x = z.reshape(z.shape[0], -1)
    h = jnp.maximum(jnp.dot(x, w1, precision=jax.lax.Precision.HIGHEST) + b1, 0.0)
    return jnp.dot(h, w2, precision=jax.lax.Precision.HIGHEST) + b2


if __name__ == "__main__":
    key = jax.random.PRNGKey(0)

    # Shapes consistent with PolicyNet: z is (batch, num_patches, embed_dim).
    batch, num_patches, embed_dim = 2, 8, 32
    hidden_dim, action_dim = 128, 4

    kz, kp, kz2, kp2 = jax.random.split(key, 4)
    z = jax.random.normal(kz, (batch, num_patches, embed_dim), jnp.float32)
    w1, b1, w2, b2 = init_policy_net_params(kp, embed_dim, num_patches, action_dim, hidden_dim)
    ref = _ref_forward(z, w1, b1, w2, b2)

    # 1) f32, W1 fully VMEM-resident (single F block).
    params = prepare_policy_params(w1, b1, w2, b2)
    out = jax.block_until_ready(policy_net_forward(z, params))
    assert out.shape == (batch, action_dim)
    assert jnp.allclose(out, ref, atol=1e-4, rtol=1e-4), "f32 single-block path mismatch"

    # 2) Forced F-tiled (accumulator) path at the same shapes.
    params_k = prepare_policy_params(w1, b1, w2, b2, f_block=128)
    out_k = jax.block_until_ready(policy_net_forward(z, params_k))
    assert jnp.allclose(out_k, ref, atol=1e-4, rtol=1e-4), "F-tiled path mismatch"

    # 3) Ragged F tiling (F=320, not a multiple of 128) exercises the in-kernel mask.
    num_patches2 = 10
    z2 = jax.random.normal(kz2, (batch, num_patches2, embed_dim), jnp.float32)
    w1r, b1r, w2r, b2r = init_policy_net_params(kp2, embed_dim, num_patches2,
                                                action_dim, hidden_dim)
    ref2 = _ref_forward(z2, w1r, b1r, w2r, b2r)
    params_r = prepare_policy_params(w1r, b1r, w2r, b2r, f_block=128)
    out_r = jax.block_until_ready(policy_net_forward(z2, params_r))
    assert jnp.allclose(out_r, ref2, atol=1e-4, rtol=1e-4), "ragged F-tiled path mismatch"

    # 4) bf16 matmul operands (recommended on v6e/v7x; HBM-bound kernel): loose check.
    params_bf16 = prepare_policy_params(w1, b1, w2, b2, use_bf16=True)
    out_bf16 = jax.block_until_ready(policy_net_forward(z, params_bf16))
    assert out_bf16.shape == (batch, action_dim)
    assert jnp.allclose(out_bf16, ref, atol=5e-2, rtol=5e-2), "bf16 path mismatch"

    print("KERNEL_OK")
</pallas_src>

<mosaic_0001>
module attributes {stable_mosaic.version = 11 : i64} {
  func.func @_policy_mlp_kernel(%arg0: i32, %arg1: memref<8x256xf32, #tpu.memory_space<vmem>>, %arg2: memref<256x128xf32, #tpu.memory_space<vmem>>, %arg3: memref<1x128xf32, #tpu.memory_space<vmem>>, %arg4: memref<128x128xf32, #tpu.memory_space<vmem>>, %arg5: memref<1x128xf32, #tpu.memory_space<vmem>>, %arg6: memref<8x128xf32, #tpu.memory_space<vmem>>) attributes {dimension_semantics = [#tpu.dimension_semantics<parallel>], iteration_bounds = array<i64: 1>, scalar_prefetch = 0 : i64, scratch_operands = 0 : i64, tpu.core_type = #tpu.core_type<tc>, window_params = [{transform_indices = @transform_0, window_bounds = array<i64: 8, 256>}, {pipeline_mode = #tpu.pipeline_mode<synchronous>, transform_indices = @transform_1, window_bounds = array<i64: 256, 128>}, {pipeline_mode = #tpu.pipeline_mode<synchronous>, transform_indices = @transform_2, window_bounds = array<i64: 1, 128>}, {pipeline_mode = #tpu.pipeline_mode<synchronous>, transform_indices = @transform_3, window_bounds = array<i64: 128, 128>}, {pipeline_mode = #tpu.pipeline_mode<synchronous>, transform_indices = @transform_4, window_bounds = array<i64: 1, 128>}, {transform_indices = @transform_5, window_bounds = array<i64: 8, 128>}]} {
    %c0 = arith.constant 0 : index
    %c0_0 = arith.constant 0 : index
    %0 = vector.load %arg1[%c0, %c0_0] : memref<8x256xf32, #tpu.memory_space<vmem>>, vector<8x256xf32>
    %c0_1 = arith.constant 0 : index
    %c0_2 = arith.constant 0 : index
    %1 = vector.load %arg2[%c0_1, %c0_2] : memref<256x128xf32, #tpu.memory_space<vmem>>, vector<256x128xf32>
    %cst = arith.constant dense<0.000000e+00> : vector<8x128xf32>
    %2 = tpu.matmul %0, %1, %cst {dimension_numbers = #tpu.dot_dimension_numbers<[1], [0], [0], [1], [0, 0, 1, 1], [], []>} : vector<8x256xf32>, vector<256x128xf32>, vector<8x128xf32> -> vector<8x128xf32>
    %c0_3 = arith.constant 0 : index
    %c0_4 = arith.constant 0 : index
    %3 = vector.load %arg3[%c0_3, %c0_4] : memref<1x128xf32, #tpu.memory_space<vmem>>, vector<1x128xf32>
    %4 = vector.broadcast %3 : vector<1x128xf32> to vector<8x128xf32>
    %5 = arith.addf %2, %4 : vector<8x128xf32>
    %cst_5 = arith.constant 0.000000e+00 : f32
    %6 = vector.broadcast %cst_5 : f32 to vector<8x128xf32>
    %7 = arith.maximumf %5, %6 : vector<8x128xf32>
    %c0_6 = arith.constant 0 : index
    %c0_7 = arith.constant 0 : index
    %8 = vector.load %arg4[%c0_6, %c0_7] : memref<128x128xf32, #tpu.memory_space<vmem>>, vector<128x128xf32>
    %cst_8 = arith.constant dense<0.000000e+00> : vector<8x128xf32>
    %9 = tpu.matmul %7, %8, %cst_8 {dimension_numbers = #tpu.dot_dimension_numbers<[1], [0], [0], [1], [0, 0, 1, 1], [], []>} : vector<8x128xf32>, vector<128x128xf32>, vector<8x128xf32> -> vector<8x128xf32>
    %c0_9 = arith.constant 0 : index
    %c0_10 = arith.constant 0 : index
    %10 = vector.load %arg5[%c0_9, %c0_10] : memref<1x128xf32, #tpu.memory_space<vmem>>, vector<1x128xf32>
    %11 = vector.broadcast %10 : vector<1x128xf32> to vector<8x128xf32>
    %12 = arith.addf %9, %11 : vector<8x128xf32>
    %c0_11 = arith.constant 0 : index
    %c0_12 = arith.constant 0 : index
    %13 = vector.load %arg6[%c0_11, %c0_12] : memref<8x128xf32, #tpu.memory_space<vmem>>, vector<8x128xf32>
    tpu.vector_store %arg6[%c0_11, %c0_12], %12 {strides = array<i32>} : memref<8x128xf32, #tpu.memory_space<vmem>>, vector<8x128xf32>,
    return
  }
  func.func @transform_0(%arg0: i32) -> (i32, i32) {
    %c0_i32 = arith.constant 0 : i32
    %c0_i32_0 = arith.constant 0 : i32
    return %arg0, %c0_i32 : i32, i32
  }
  func.func @transform_1(%arg0: i32) -> (i32, i32) {
    %c0_i32 = arith.constant 0 : i32
    %c0_i32_0 = arith.constant 0 : i32
    %c0_i32_1 = arith.constant 0 : i32
    return %c0_i32, %c0_i32_0 : i32, i32
  }
  func.func @transform_2(%arg0: i32) -> (i32, i32) {
    %c0_i32 = arith.constant 0 : i32
    %c0_i32_0 = arith.constant 0 : i32
    %c0_i32_1 = arith.constant 0 : i32
    return %c0_i32, %c0_i32_0 : i32, i32
  }
  func.func @transform_3(%arg0: i32) -> (i32, i32) {
    %c0_i32 = arith.constant 0 : i32
    %c0_i32_0 = arith.constant 0 : i32
    %c0_i32_1 = arith.constant 0 : i32
    return %c0_i32, %c0_i32_0 : i32, i32
  }
  func.func @transform_4(%arg0: i32) -> (i32, i32) {
    %c0_i32 = arith.constant 0 : i32
    %c0_i32_0 = arith.constant 0 : i32
    %c0_i32_1 = arith.constant 0 : i32
    return %c0_i32, %c0_i32_0 : i32, i32
  }
  func.func @transform_5(%arg0: i32) -> (i32, i32) {
    %c0_i32 = arith.constant 0 : i32
    %c0_i32_0 = arith.constant 0 : i32
    return %arg0, %c0_i32 : i32, i32
  }
}

</mosaic_0001>

<bundles_post_ra>
// kernel: _policy_forward_impl.1
= control target key start
LH: loop header
LB: loop body
LE: loop exit
PB: predicated region body
PF: predicated region fallthrough
CT: control target
= control target key end

     0   :  { %10 = vsyncpa [#allocation3], 0  ;;  %s631_s0 = inlined_call_operand.vmem [shape: f32[2,256], index: 0, kind: input, shape index: {}]   ;;  %s632_s1 = inlined_call_operand.hbm [shape: f32[256,128], index: 1, kind: input, shape index: {}]   ;;  %s633_s2 = inlined_call_operand.vmem [shape: f32[1,128], index: 2, kind: input, shape index: {}]   ;;  %s634_s3 = inlined_call_operand.hbm [shape: f32[128,128], index: 3, kind: input, shape index: {}]   ;;  %s635_s4 = inlined_call_operand.vmem [shape: f32[1,128], index: 4, kind: input, shape index: {}]   ;;  %s636_s5 = inlined_call_operand.hbm [shape: f32[2,128], index: 5, kind: output, shape index: {}]  }
   0x1   :  { %11 = vsyncpa [#allocation6], 0 }
   0x2   :  { %12 = vsyncpa [#allocation4], 0  ;;  %s531_s18 = smov [#allocation2]   ;;  %s459_s22 = scalar_lea.hbm %s632_s1, 4096 }
   0x3   :  { %s20_s19 = sshll.u32 %s531_s18, 4  ;;  %p460_p0 = scmp.ne.s32.totalorder %s632_s1, %s459_s22  ;;  %s21_s19 = int_to_ptr.vmem [resolvable:$true] %s20_s19 }
   0x4   :  { %p463_p1 = scmp.lt.u32.totalorder %s459_s22, %s632_s1 }
   0x6   :  { %p465_p2 = pnand %p463_p1, %p460_p0 }
   0x8   :  { %468 = shalt.err (!%p465_p2)
}
   0x9   :  { %s469_s27 = scalar_lea.vmem %s21_s19, 4096  ;;  %p474_p4 = scmp.lt.s32.totalorder %s21_s19, %s21_s19 }
   0xa   :  { %p470_p3 = scmp.ne.s32.totalorder %s21_s19, %s469_s27  ;;  %p475_p5 = scmp.lt.s32.totalorder %s469_s27, %s469_s27 }
   0xc   :  { %p476_p6 = por %p475_p5, %p474_p4 }
   0xe   :  { %p477_p7 = pnand %p476_p6, %p470_p3 }
  0x10   :  { %480 = shalt.err (!%p477_p7)
}
  0x11   :  { %s532_s28 = smov 128   ;;  %s533_s29 = smov 8  }
  0x12   :  { %26 = dma.hbm_to_vmem [thread:$0]  %s632_s1, 4096, %s21_s19, [#allocation3], %s532_s28, %s532_s28, %s533_s29  }
  0x13   :  { %s534_s7 = smov [#allocation5]   ;;  %s481_s11 = scalar_lea.hbm %s634_s3, 2048 }
  0x14   :  { %s34_s8 = sshll.u32 %s534_s7, 4  ;;  %p482_p8 = scmp.ne.s32.totalorder %s634_s3, %s481_s11  ;;  %s35_s8 = int_to_ptr.vmem [resolvable:$true] %s34_s8 }
  0x15   :  { %p485_p9 = scmp.lt.u32.totalorder %s481_s11, %s634_s3 }
  0x17   :  { %p487_p10 = pnand %p485_p9, %p482_p8 }
  0x19   :  { %490 = shalt.err (!%p487_p10)
}
  0x1a   :  { %s491_s16 = scalar_lea.vmem %s35_s8, 2048  ;;  %p496_p12 = scmp.lt.s32.totalorder %s35_s8, %s35_s8 }
  0x1b   :  { %p492_p11 = scmp.ne.s32.totalorder %s35_s8, %s491_s16  ;;  %p497_p13 = scmp.lt.s32.totalorder %s491_s16, %s491_s16 }
  0x1d   :  { %p498_p0 = por %p497_p13, %p496_p12 }
  0x1f   :  { %p499_p1 = pnand %p498_p0, %p492_p11 }
  0x21   :  { %502 = shalt.err (!%p499_p1)
}
  0x22   :  { %40 = dma.hbm_to_vmem [thread:$0]  %s634_s3, 2048, %s35_s8, [#allocation6], %s532_s28, %s532_s28, %s533_s29  }
  0x23   :  { %525 = dma.done.wait [#allocation3], 4096  }
  0x24   :  { %526 = vsyncadd [#allocation3], 4294963200 }
  0x25   :  { %527 = dma.done.wait [#allocation6], 2048  }
  0x26   :  { %528 = vsyncadd [#allocation6], 4294965248  ;;  %v535_v0 = vmov 0.0|0.0   ;;  %v69_v1 = vld [vmem:[#allocation2 + $0x80] sm:$0xff]  ;;  %v70_v2 = vld [vmem:[#allocation2 + $0x88] sm:$0xff]  ;;  %vm536_vm0 = vmmov 0  }
  0x27   :  { %420 = vmatprep.subr.bf16.mxu1 %v535_v0  ;;  %v53_v3 = vld [vmem:[#allocation2] sm:$0xff]  ;;  %v388_v4 = vpack.c.bf16 %v70_v2, %v69_v1  ;;  %v54_v5 = vld [vmem:[#allocation2 + $0x8] sm:$0xff]  ;;  %v71_v6 = vld [vmem:[#allocation2 + $0x90] sm:$0xff] }
  0x28   :  { %v72_v7 = vld [vmem:[#allocation2 + $0x98] sm:$0xff]  ;;  %v390_v8 = vpack.c.bf16 %v54_v5, %v53_v3  ;;  %v55_v10 = vld [vmem:[#allocation2 + $0x10] sm:$0xff]  ;;  %v73_v12 = vld [vmem:[#allocation2 + $0xa0] sm:$0xff] }
  0x29   :  { %v392_v9 = vpack.c.bf16 %v72_v7, %v71_v6  ;;  %v56_v11 = vld [vmem:[#allocation2 + $0x18] sm:$0xff]  ;;  %389 = vmatprep.subr.bf16.mxu0 %v388_v4  ;;  %v74_v13 = vld [vmem:[#allocation2 + $0xa8] sm:$0xff]  ;;  %v57_v16 = vld [vmem:[#allocation2 + $0x20] sm:$0xff] }
  0x2a   :  { %391 = vmatpush3.bf16.msra.mxu0 %v390_v8  ;;  %v394_v14 = vpack.c.bf16 %v56_v11, %v55_v10  ;;  %v396_v15 = vpack.c.bf16 %v74_v13, %v73_v12  ;;  %v58_v17 = vld [vmem:[#allocation2 + $0x28] sm:$0xff]  ;;  %v75_v18 = vld [vmem:[#allocation2 + $0xb0] sm:$0xff]  ;;  %v76_v19 = vld [vmem:[#allocation2 + $0xb8] sm:$0xff] }
  0x2b   :  { %393 = vmatprep.subr.bf16.mxu0 %v392_v9  ;;  %v398_v20 = vpack.c.bf16 %v58_v17, %v57_v16  ;;  %v400_v21 = vpack.c.bf16 %v76_v19, %v75_v18  ;;  %v59_v22 = vld [vmem:[#allocation2 + $0x30] sm:$0xff]  ;;  %v60_v23 = vld [vmem:[#allocation2 + $0x38] sm:$0xff]  ;;  %v77_v24 = vld [vmem:[#allocation2 + $0xc0] sm:$0xff] }
  0x2c   :  { %v78_v25 = vld [vmem:[#allocation2 + $0xc8] sm:$0xff]  ;;  %v61_v26 = vld [vmem:[#allocation2 + $0x40] sm:$0xff]  ;;  %v402_v28 = vpack.c.bf16 %v60_v23, %v59_v22  ;;  %v599_v29 = vld.sshfl [vmem:[%s631_s0] sm:$0xff pattern:$0x76325410] }
  0x2d   :  { %v62_v27 = vld [vmem:[#allocation2 + $0x48] sm:$0xff]  ;;  %v458_v30 = vld.sshfl [vmem:[%s631_s0 + $0x8] sm:$0xff pattern:$0x76325410]  ;;  %v404_v32 = vpack.c.bf16 %v78_v25, %v77_v24  ;;  %v189_v34 = vld [vmem:[#allocation5 + $0x10] sm:$0xff] }
  0x2e   :  { %395 = vmatpush3.bf16.msra.mxu0 %v394_v14  ;;  %v187_v31 = vld [vmem:[#allocation5] sm:$0xff]  ;;  %v188_v33 = vld [vmem:[#allocation5 + $0x8] sm:$0xff]  ;;  %v190_v35 = vld [vmem:[#allocation5 + $0x18] sm:$0xff]  ;;  %v406_v39 = vpack.c.bf16 %v62_v27, %v61_v26  ;;  %v113_v41 = vcombine.high %v599_v29, %v458_v30  ;;  %v112_v6 = vcombine.low %v599_v29, %v458_v30  ;;  %v537_v14 = vmov 0.0  }
  0x2f   :  { %397 = vmatprep.subr.bf16.mxu0 %v396_v15  ;;  %v79_v36 = vld [vmem:[#allocation2 + $0xd0] sm:$0xff]  ;;  %v80_v37 = vld [vmem:[#allocation2 + $0xd8] sm:$0xff]  ;;  %v421_v38 = vpack.c.bf16 %v188_v33, %v187_v31  ;;  %v424_v42 = vpack.c.bf16 %v190_v35, %v189_v34  ;;  %v191_v45 = vld [vmem:[#allocation5 + $0x20] sm:$0xff]  ;;  %385 = vmatprep.mubr.msk.f32.mxu1 %vm536_vm0, %v537_v14 }
  0x30   :  { %v63_v40 = vld [vmem:[#allocation2 + $0x50] sm:$0xff]  ;;  %v408_v43 = vpack.c.bf16 %v80_v37, %v79_v36  ;;  %v64_v44 = vld [vmem:[#allocation2 + $0x58] sm:$0xff]  ;;  %v192_v46 = vld [vmem:[#allocation5 + $0x28] sm:$0xff]  ;;  %180 = vmatprep.mubr.f32.mxu0 %v113_v41 }
  0x31   :  { %422 = vmatpush3.bf16.msra.mxu1 %v421_v38  ;;  %v81_v47 = vld [vmem:[#allocation2 + $0xe0] sm:$0xff]  ;;  %v82_v48 = vld [vmem:[#allocation2 + $0xe8] sm:$0xff]  ;;  %v410_v49 = vpack.c.bf16 %v64_v44, %v63_v40  ;;  %v427_v51 = vpack.c.bf16 %v192_v46, %v191_v45  ;;  %v193_v54 = vld [vmem:[#allocation5 + $0x30] sm:$0xff] }
  0x32   :  { %399 = vmatpush3.bf16.msra.mxu0 %v398_v20  ;;  %423 = vmatprep.subr.bf16.mxu1 %v535_v0  ;;  %v65_v50 = vld [vmem:[#allocation2 + $0x60] sm:$0xff]  ;;  %v412_v52 = vpack.c.bf16 %v82_v48, %v81_v47  ;;  %v66_v53 = vld [vmem:[#allocation2 + $0x68] sm:$0xff]  ;;  %v194_v55 = vld [vmem:[#allocation5 + $0x38] sm:$0xff] }
  0x33   :  { %401 = vmatprep.subr.bf16.mxu0 %v400_v21  ;;  %v83_v56 = vld [vmem:[#allocation2 + $0xf0] sm:$0xff]  ;;  %v84_v57 = vld [vmem:[#allocation2 + $0xf8] sm:$0xff]  ;;  %v414_v58 = vpack.c.bf16 %v66_v53, %v65_v50  ;;  %v430_v60 = vpack.c.bf16 %v194_v55, %v193_v54  ;;  %v195_v63 = vld [vmem:[#allocation5 + $0x40] sm:$0xff] }
  0x34   :  { %v67_v59 = vld [vmem:[#allocation2 + $0x70] sm:$0xff]  ;;  %v416_v61 = vpack.c.bf16 %v84_v57, %v83_v56  ;;  %v68_v62 = vld [vmem:[#allocation2 + $0x78] sm:$0xff]  ;;  %v196_v1 = vld [vmem:[#allocation5 + $0x48] sm:$0xff] }
  0x35   :  { %425 = vmatpush3.bf16.msra.mxu1 %v424_v42  ;;  %v418_v2 = vpack.c.bf16 %v68_v62, %v67_v59  ;;  %v433_v3 = vpack.c.bf16 %v196_v1, %v195_v63  ;;  %v197_v4 = vld [vmem:[#allocation5 + $0x50] sm:$0xff]  ;;  %v198_v5 = vld [vmem:[#allocation5 + $0x58] sm:$0xff]  ;;  %v199_v8 = vld [vmem:[#allocation5 + $0x60] sm:$0xff] }
  0x36   :  { %403 = vmatpush3.bf16.msra.mxu0 %v402_v28  ;;  %426 = vmatprep.subr.bf16.mxu1 %v535_v0  ;;  %v436_v7 = vpack.c.bf16 %v198_v5, %v197_v4  ;;  %v200_v9 = vld [vmem:[#allocation5 + $0x68] sm:$0xff]  ;;  %v201_v11 = vld [vmem:[#allocation5 + $0x70] sm:$0xff]  ;;  %v202_v12 = vld [vmem:[#allocation5 + $0x78] sm:$0xff] }
  0x37   :  { %405 = vmatprep.subr.bf16.mxu0 %v404_v32  ;;  %v439_v10 = vpack.c.bf16 %v200_v9, %v199_v8  ;;  %v442_v13 = vpack.c.bf16 %v202_v12, %v201_v11  ;;  %v299_v16 = vld [vmem:[%s633_s2] ss:$0 sm:$0xff] }
  0x39   :  { %428 = vmatpush3.bf16.msra.mxu1 %v427_v51 }
  0x3a   :  { %407 = vmatpush3.bf16.msra.mxu0 %v406_v39  ;;  %429 = vmatprep.subr.bf16.mxu1 %v535_v0 }
  0x3b   :  { %409 = vmatprep.subr.bf16.mxu0 %v408_v43 }
  0x3d   :  { %431 = vmatpush3.bf16.msra.mxu1 %v430_v60 }
  0x3e   :  { %411 = vmatpush3.bf16.msra.mxu0 %v410_v49  ;;  %432 = vmatprep.subr.bf16.mxu1 %v535_v0 }
  0x3f   :  { %413 = vmatprep.subr.bf16.mxu0 %v412_v52 }
  0x41   :  { %434 = vmatpush3.bf16.msra.mxu1 %v433_v3 }
  0x42   :  { %415 = vmatpush3.bf16.msra.mxu0 %v414_v58  ;;  %435 = vmatprep.subr.bf16.mxu1 %v535_v0 }
  0x43   :  { %417 = vmatprep.subr.bf16.mxu0 %v416_v61 }
  0x45   :  { %437 = vmatpush3.bf16.msra.mxu1 %v436_v7 }
  0x46   :  { %419 = vmatpush3.bf16.msra.mxu0 %v418_v2  ;;  %438 = vmatprep.subr.bf16.mxu1 %v535_v0 }
  0x49   :  { %181 = vmatmul.mubr.f32.vlgmr.msra.gmra.mrb[0].mxu0 %v112_v6  ;;  %440 = vmatpush3.bf16.msra.mxu1 %v439_v10 }
  0x4a   :  { %441 = vmatprep.subr.bf16.mxu1 %v535_v0  ;;  %v300_v0 = vld [vmem:[%s635_s4] ss:$0 sm:$0xff] }
  0x4d   :  { %443 = vmatpush3.bf16.msra.mxu1 %v442_v13 }
 0x11c   :  { %v333_v15 = vpop.f32.mrb[0].mxu0 }
 0x11d   :  { %v334_v17 = vpop.f32.mrb[1].mxu0 }
 0x11e   :  { %v335_v18 = vadd.f32 %v334_v17, %v333_v15 }
 0x120   :  { %v183_v19 = vadd.f32 %v335_v18, %v299_v16 }
 0x122   :  { %v186_v20 = vmax.f32 %v183_v19, 0.0 }
 0x124   :  { %386 = vmatmul.mubr.f32.vlgmr.msra.gmra.mrb[0].mxu1 %v186_v20 }
 0x1f7   :  { %v276_v21 = vpop.f32.mrb[0].mxu1 }
 0x1f8   :  { %v277_v22 = vadd.f32 %v300_v0, %v276_v21  ;;  %v387_v23 = vpop.f32.mrb[1].mxu1 }
 0x1fa   :  { %280 = vst [vmem:[#allocation7] sm:$0xff] %v277_v22 }
 0x1fb   :  { %285 = vsyncadd [#allocation4], 96  ;;  %s538_s24 = smov [#allocation7]  }
 0x1fc   :  { %s286_s25 = sshll.u32 %s538_s24, 4  ;;  %s287_s25 = int_to_ptr.vmem [resolvable:$true] %s286_s25 }
 0x1fd   :  { %s503_s26 = scalar_lea.vmem %s287_s25, 32  ;;  %s507_s2 = scalar_lea.vmem %s287_s25, 128 }
 0x1fe   :  { %p504_p2 = scmp.ne.s32.totalorder %s287_s25, %s503_s26  ;;  %p508_p3 = scmp.lt.s32.totalorder %s287_s25, %s287_s25 }
 0x1ff   :  { %p509_p4 = scmp.lt.s32.totalorder %s507_s2, %s503_s26 }
 0x201   :  { %p510_p5 = por %p509_p4, %p508_p3 }
 0x203   :  { %p511_p6 = pnand %p510_p5, %p504_p2 }
 0x205   :  { %514 = shalt.err (!%p511_p6)
}
 0x206   :  { %s515_s4 = scalar_lea.hbm %s636_s5, 32 }
 0x207   :  { %p516_p7 = scmp.ne.s32.totalorder %s636_s5, %s515_s4  ;;  %p519_p8 = scmp.lt.u32.totalorder %s515_s4, %s636_s5 }
 0x209   :  { %p521_p9 = pnand %p519_p8, %p516_p7 }
 0x20b   :  { %524 = shalt.err (!%p521_p9)
}
 0x20c   :  { %s539_s8 = smov 32   ;;  %s540_s9 = smov 2  }
 0x20d   :  { %292 = dma.vmem_to_hbm [thread:$0]  %s287_s25, 32, %s636_s5, [#allocation4], %s539_s8, %s539_s8, %s540_s9  }
 0x20e   :  { %529 = dma.done.wait [#allocation4], 128  }
 0x20f   :  { %530 = vsyncadd [#allocation4], 4294967168 }
 0x210   :  { %296 = vsyncpa [#allocation3], 1 }
 0x211   :  { %297 = vsyncpa [#allocation6], 1 }
 0x212   :  { %298 = vsyncpa [#allocation4], 1 }

</bundles_post_ra>
